<compile_context>
chip_gen: v7x
topology: tpu7x:2x2x1
jax: 0.10.0
libtpu: 0.0.40
codegen_flags: <defaults>
</compile_context>

<pallas_src>
import functools

import jax
import jax.numpy as jnp
from jax import lax
from jax.experimental import pallas as pl
from jax.experimental.pallas import tpu as pltpu


def _feature_extractor_kernel(
    x_ref,              # (B, Din_pad) f32
    w1_ref,             # (Din_pad, E) bf16   conv1 center tap (bias cancels in BN)
    g1_ref, be1_ref,    # (1, E)       f32    batchnorm1 gamma / beta
    w2_ref,             # (E, H)       bf16   conv2 center tap (bias cancels in BN)
    g2_ref, be2_ref,    # (1, H)       f32    batchnorm2 gamma / beta
    wl_ref,             # (H, 6L)      bf16   fused LSTM weights, [i_f|i_b|g_f|g_b|o_f|o_b]
    bl_ref,             # (1, 6L)      f32    fused b_ih + b_hh, same interleaved layout
    out_ref,            # (B, 2L)      f32
    *,
    bf16_epilogue: bool,
):
    eps = 1e-5
    inv_b = 1.0 / x_ref.shape[0]

    def bn_relu(h, g_ref, be_ref):
        # Two-pass (shifted) batch stats: mu, then var = E[(h - mu)^2] (biased).
        # Robust against the one-pass cancellation; the centered activations are
        # reused directly in the affine so the extra cost is ~one subtract.
        mu = jnp.sum(h, axis=0, keepdims=True) * inv_b
        hc = h - mu
        var = jnp.sum(hc * hc, axis=0, keepdims=True) * inv_b
        scale = g_ref[...] * lax.rsqrt(var + eps)
        return jnp.maximum(hc * scale + be_ref[...], 0.0)

    # ---- Conv1 (center tap, bf16 MXU) + BN(train) + ReLU --------------------
    h = jnp.dot(x_ref[...].astype(jnp.bfloat16), w1_ref[...],
                preferred_element_type=jnp.float32)
    h = bn_relu(h, g1_ref, be1_ref)

    # ---- Conv2 (center tap, bf16 MXU) + BN(train) + ReLU --------------------
    h2 = jnp.dot(h.astype(jnp.bfloat16), w2_ref[...],
                 preferred_element_type=jnp.float32)
    h2 = bn_relu(h2, g2_ref, be2_ref)

    # ---- Fused bidirectional LSTM, seq len 1, zero (h0, c0) -----------------
    # gates = h2 @ [i_f|i_b | g_f|g_b | o_f|o_b] + (b_ih + b_hh); f gate pruned
    # (f * c0 == 0).  Directions interleaved per gate so each nonlinearity runs
    # on one contiguous (B, 2L) slab and the output is a single full-width,
    # lane-dense store (fwd lands in out[:, :L], bwd in out[:, L:2L]).
    gates = jnp.dot(h2.astype(jnp.bfloat16), wl_ref[...],
                    preferred_element_type=jnp.float32) + bl_ref[...]
    if bf16_epilogue:
        # v6e/v7x: bf16 EUP/VPU paths -> ~2x throughput on the sigmoid/tanh tail.
        gates = gates.astype(jnp.bfloat16)

    two_l = out_ref.shape[-1]                       # 2L (multiple of 128)
    i = jax.nn.sigmoid(gates[:, 0 * two_l:1 * two_l])
    g = jnp.tanh(gates[:, 1 * two_l:2 * two_l])
    o = jax.nn.sigmoid(gates[:, 2 * two_l:3 * two_l])
    # c = i * g (since c0 = 0); h = o * tanh(c).  One unmasked (B, 2L) store.
    out_ref[...] = (o * jnp.tanh(i * g)).astype(out_ref.dtype)

    # AdaptiveMaxPool1d(1) over the length-1 sequence axis is the identity.


def _bf16_epilogue_default():
    """bf16 nonlinearity tail only on chips with bf16 VPU/EUP (v6e, v7x)."""
    try:
        kind = jax.devices()[0].device_kind.lower()
    except Exception:  # pragma: no cover - conservative fallback
        return False
    return ("v6" in kind) or ("v7" in kind)


def _vmem_budget_bytes(b, din_pad, e, h, two_l):
    """Right-sized scoped-VMEM budget: operands + intermediates, 2x headroom."""
    six_l = 3 * two_l
    operands = (4 * b * din_pad                      # x (f32)
                + 2 * din_pad * e + 2 * 4 * e        # w1 (bf16) + g1/be1
                + 2 * e * h + 2 * 4 * h              # w2 (bf16) + g2/be2
                + 2 * h * six_l + 4 * six_l          # w_lstm (bf16) + b_lstm
                + 4 * b * two_l)                     # out (f32)
    intermediates = (4 * b * e + 4 * b * h           # h, h2
                     + 4 * b * six_l                 # gates (f32 worst case)
                     + 3 * 4 * b * two_l)            # i, g, o
    budget = 2 * (operands + intermediates)
    budget = max(budget, 16 << 20)                   # floor for compiler temps
    return min(budget, 100 << 20)                    # never above v5e/v6e phys.


def feature_extractor(x, params, *, bf16_epilogue=None):
    """x: (B, input_dim) float32 -> (B, 2 * lstm_hidden_dim) float32.

    NOTE: training-mode BatchNorm couples all B rows, so the whole batch is
    processed in one invocation (no B tiling).  If B is ever tiled (incl. the
    v7x 2-core split), BN stats must be aggregated across tiles first.
    """
    if bf16_epilogue is None:
        bf16_epilogue = _bf16_epilogue_default()

    B, din = x.shape
    din_pad = params["w1"].shape[0]
    if din_pad != din:
        # Lane-align the conv1 contraction dim; padded w1 rows are zero so the
        # extra x columns are inert.
        x = jnp.pad(x, ((0, 0), (0, din_pad - din)))

    E = params["w1"].shape[1]
    H = params["w2"].shape[1]
    two_L = params["w_lstm"].shape[-1] // 3          # 6L / 3

    operands = (
        x,
        params["w1"], params["g1"], params["be1"],
        params["w2"], params["g2"], params["be2"],
        params["w_lstm"], params["b_lstm"],
    )
    vmem_spec = pl.BlockSpec(memory_space=pltpu.MemorySpace.VMEM)
    kernel = functools.partial(_feature_extractor_kernel,
                               bf16_epilogue=bf16_epilogue)
    return pl.pallas_call(
        kernel,
        out_shape=jax.ShapeDtypeStruct((B, two_L), jnp.float32),
        in_specs=[vmem_spec] * len(operands),
        out_specs=vmem_spec,
        compiler_params=pltpu.CompilerParams(
            vmem_limit_bytes=_vmem_budget_bytes(B, din_pad, E, H, two_L),
        ),
    )(*operands)


def init_params(key, input_dim, embedding_dim, hidden_dim, lstm_hidden_dim):
    """Deterministic synthetic parameters (PyTorch-style uniform fan-in init),
    pre-folded for the fused kernel:
      * conv weights: only the center tap of the (out, in, 3) filter, stored
        transposed (in, out) in bf16, rows zero-padded to a multiple of 128;
        conv biases dropped (cancel under training-mode BN).
      * LSTM: per-direction W_ih stored (H, 4L) in PyTorch gate order
        (i, f, g, o); f-gate columns pruned, directions interleaved per gate
        -> (H, 6L) bf16 laid out [i_f|i_b | g_f|g_b | o_f|o_b]; biases
        b_ih + b_hh folded, pruned and interleaved the same way -> (1, 6L) f32.
    """
    ks = jax.random.split(key, 8)
    L = lstm_hidden_dim

    def u(k, shape, fan_in):
        bound = 1.0 / jnp.sqrt(fan_in)
        return jax.random.uniform(k, shape, jnp.float32, -bound, bound)

    din_pad = ((input_dim + 127) // 128) * 128
    din_pad = max(din_pad, 128)
    w1 = u(ks[0], (input_dim, embedding_dim), 3 * input_dim)
    w1 = jnp.pad(w1, ((0, din_pad - input_dim), (0, 0)))     # zero rows
    w2 = u(ks[1], (embedding_dim, hidden_dim), 3 * embedding_dim)

    # BatchNorm affine params (PyTorch default gamma=1, beta=0).
    g1 = jnp.ones((1, embedding_dim), jnp.float32)
    be1 = jnp.zeros((1, embedding_dim), jnp.float32)
    g2 = jnp.ones((1, hidden_dim), jnp.float32)
    be2 = jnp.zeros((1, hidden_dim), jnp.float32)

    # LSTM per-direction weights (H, 4L), PyTorch gate order (i, f, g, o).
    wf = u(ks[2], (hidden_dim, 4 * L), L)
    wb = u(ks[3], (hidden_dim, 4 * L), L)
    bf = u(ks[4], (1, 4 * L), L) + u(ks[5], (1, 4 * L), L)    # b_ih + b_hh
    bb = u(ks[6], (1, 4 * L), L) + u(ks[7], (1, 4 * L), L)

    def interleave(af, ab):
        # Drop f columns (multiplied by c0 = 0) and interleave the two
        # directions per gate: [i_f|i_b | g_f|g_b | o_f|o_b], each slab 2L.
        return jnp.concatenate(
            [af[:, 0 * L:1 * L], ab[:, 0 * L:1 * L],
             af[:, 2 * L:3 * L], ab[:, 2 * L:3 * L],
             af[:, 3 * L:4 * L], ab[:, 3 * L:4 * L]], axis=-1)

    w_lstm = interleave(wf, wb)          # (H, 6L)
    b_lstm = interleave(bf, bb)          # (1, 6L)

    return dict(
        w1=w1.astype(jnp.bfloat16), g1=g1, be1=be1,
        w2=w2.astype(jnp.bfloat16), g2=g2, be2=be2,
        w_lstm=w_lstm.astype(jnp.bfloat16), b_lstm=b_lstm,
    )


if __name__ == "__main__":
    # Small shapes consistent with the module (defaults 505/960/512 shrunk,
    # kept as multiples of 128 for lane-aligned gate slabs / output store).
    B, INPUT_DIM = 8, 32
    EMBEDDING_DIM, HIDDEN_DIM, LSTM_HIDDEN_DIM = 128, 256, 128

    key = jax.random.PRNGKey(0)
    k_x, k_p = jax.random.split(key)
    x = jax.random.normal(k_x, (B, INPUT_DIM), jnp.float32)
    params = init_params(k_p, INPUT_DIM, EMBEDDING_DIM, HIDDEN_DIM,
                         LSTM_HIDDEN_DIM)

    out = feature_extractor(x, params)
    out = jax.block_until_ready(out)
    assert out.shape == (B, 2 * LSTM_HIDDEN_DIM), out.shape
    assert out.dtype == jnp.float32
    assert bool(jnp.all(jnp.isfinite(out)))
    print("KERNEL_OK")
</pallas_src>

<mosaic_0001>
module attributes {stable_mosaic.version = 11 : i64} {
  func.func @_feature_extractor_kernel(%arg0: memref<8x128xf32, #tpu.memory_space<vmem>>, %arg1: memref<128x128xbf16, #tpu.memory_space<vmem>>, %arg2: memref<1x128xf32, #tpu.memory_space<vmem>>, %arg3: memref<1x128xf32, #tpu.memory_space<vmem>>, %arg4: memref<128x256xbf16, #tpu.memory_space<vmem>>, %arg5: memref<1x256xf32, #tpu.memory_space<vmem>>, %arg6: memref<1x256xf32, #tpu.memory_space<vmem>>, %arg7: memref<256x768xbf16, #tpu.memory_space<vmem>>, %arg8: memref<1x768xf32, #tpu.memory_space<vmem>>, %arg9: memref<8x256xf32, #tpu.memory_space<vmem>>) attributes {dimension_semantics = [], scalar_prefetch = 0 : i64, scratch_operands = 0 : i64, tpu.core_type = #tpu.core_type<tc>} {
    %c0 = arith.constant 0 : index
    %c0_0 = arith.constant 0 : index
    %0 = vector.load %arg0[%c0, %c0_0] : memref<8x128xf32, #tpu.memory_space<vmem>>, vector<8x128xf32>
    %1 = arith.truncf %0 : vector<8x128xf32> to vector<8x128xbf16>
    %c0_1 = arith.constant 0 : index
    %c0_2 = arith.constant 0 : index
    %2 = vector.load %arg1[%c0_1, %c0_2] : memref<128x128xbf16, #tpu.memory_space<vmem>>, vector<128x128xbf16>
    %cst = arith.constant dense<0.000000e+00> : vector<8x128xf32>
    %3 = tpu.matmul %1, %2, %cst {dimension_numbers = #tpu.dot_dimension_numbers<[1], [0], [0], [1], [0, 0, 1, 1], [], []>} : vector<8x128xbf16>, vector<128x128xbf16>, vector<8x128xf32> -> vector<8x128xf32>
    %cst_3 = arith.constant dense<0.000000e+00> : vector<128xf32>
    %4 = vector.multi_reduction <add>, %3, %cst_3 [0] : vector<8x128xf32> to vector<128xf32>
    %5 = vector.shape_cast %4 : vector<128xf32> to vector<1x128xf32>
    %cst_4 = arith.constant 1.250000e-01 : f32
    %6 = vector.broadcast %cst_4 : f32 to vector<1x128xf32>
    %7 = arith.mulf %5, %6 : vector<1x128xf32>
    %8 = vector.broadcast %7 : vector<1x128xf32> to vector<8x128xf32>
    %9 = arith.subf %3, %8 : vector<8x128xf32>
    %10 = arith.mulf %9, %9 : vector<8x128xf32>
    %cst_5 = arith.constant dense<0.000000e+00> : vector<128xf32>
    %11 = vector.multi_reduction <add>, %10, %cst_5 [0] : vector<8x128xf32> to vector<128xf32>
    %12 = vector.shape_cast %11 : vector<128xf32> to vector<1x128xf32>
    %cst_6 = arith.constant 1.250000e-01 : f32
    %13 = vector.broadcast %cst_6 : f32 to vector<1x128xf32>
    %14 = arith.mulf %12, %13 : vector<1x128xf32>
    %c0_7 = arith.constant 0 : index
    %c0_8 = arith.constant 0 : index
    %15 = vector.load %arg2[%c0_7, %c0_8] : memref<1x128xf32, #tpu.memory_space<vmem>>, vector<1x128xf32>
    %cst_9 = arith.constant 9.99999974E-6 : f32
    %16 = vector.broadcast %cst_9 : f32 to vector<1x128xf32>
    %17 = arith.addf %14, %16 : vector<1x128xf32>
    %18 = math.rsqrt %17 : vector<1x128xf32>
    %19 = arith.mulf %15, %18 : vector<1x128xf32>
    %20 = vector.broadcast %19 : vector<1x128xf32> to vector<8x128xf32>
    %21 = arith.mulf %9, %20 : vector<8x128xf32>
    %c0_10 = arith.constant 0 : index
    %c0_11 = arith.constant 0 : index
    %22 = vector.load %arg3[%c0_10, %c0_11] : memref<1x128xf32, #tpu.memory_space<vmem>>, vector<1x128xf32>
    %23 = vector.broadcast %22 : vector<1x128xf32> to vector<8x128xf32>
    %24 = arith.addf %21, %23 : vector<8x128xf32>
    %cst_12 = arith.constant 0.000000e+00 : f32
    %25 = vector.broadcast %cst_12 : f32 to vector<8x128xf32>
    %26 = arith.maximumf %24, %25 : vector<8x128xf32>
    %27 = arith.truncf %26 : vector<8x128xf32> to vector<8x128xbf16>
    %c0_13 = arith.constant 0 : index
    %c0_14 = arith.constant 0 : index
    %28 = vector.load %arg4[%c0_13, %c0_14] : memref<128x256xbf16, #tpu.memory_space<vmem>>, vector<128x256xbf16>
    %cst_15 = arith.constant dense<0.000000e+00> : vector<8x256xf32>
    %29 = tpu.matmul %27, %28, %cst_15 {dimension_numbers = #tpu.dot_dimension_numbers<[1], [0], [0], [1], [0, 0, 1, 1], [], []>} : vector<8x128xbf16>, vector<128x256xbf16>, vector<8x256xf32> -> vector<8x256xf32>
    %cst_16 = arith.constant dense<0.000000e+00> : vector<256xf32>
    %30 = vector.multi_reduction <add>, %29, %cst_16 [0] : vector<8x256xf32> to vector<256xf32>
    %31 = vector.shape_cast %30 : vector<256xf32> to vector<1x256xf32>
    %cst_17 = arith.constant 1.250000e-01 : f32
    %32 = vector.broadcast %cst_17 : f32 to vector<1x256xf32>
    %33 = arith.mulf %31, %32 : vector<1x256xf32>
    %34 = vector.broadcast %33 : vector<1x256xf32> to vector<8x256xf32>
    %35 = arith.subf %29, %34 : vector<8x256xf32>
    %36 = arith.mulf %35, %35 : vector<8x256xf32>
    %cst_18 = arith.constant dense<0.000000e+00> : vector<256xf32>
    %37 = vector.multi_reduction <add>, %36, %cst_18 [0] : vector<8x256xf32> to vector<256xf32>
    %38 = vector.shape_cast %37 : vector<256xf32> to vector<1x256xf32>
    %cst_19 = arith.constant 1.250000e-01 : f32
    %39 = vector.broadcast %cst_19 : f32 to vector<1x256xf32>
    %40 = arith.mulf %38, %39 : vector<1x256xf32>
    %c0_20 = arith.constant 0 : index
    %c0_21 = arith.constant 0 : index
    %41 = vector.load %arg5[%c0_20, %c0_21] : memref<1x256xf32, #tpu.memory_space<vmem>>, vector<1x256xf32>
    %cst_22 = arith.constant 9.99999974E-6 : f32
    %42 = vector.broadcast %cst_22 : f32 to vector<1x256xf32>
    %43 = arith.addf %40, %42 : vector<1x256xf32>
    %44 = math.rsqrt %43 : vector<1x256xf32>
    %45 = arith.mulf %41, %44 : vector<1x256xf32>
    %46 = vector.broadcast %45 : vector<1x256xf32> to vector<8x256xf32>
    %47 = arith.mulf %35, %46 : vector<8x256xf32>
    %c0_23 = arith.constant 0 : index
    %c0_24 = arith.constant 0 : index
    %48 = vector.load %arg6[%c0_23, %c0_24] : memref<1x256xf32, #tpu.memory_space<vmem>>, vector<1x256xf32>
    %49 = vector.broadcast %48 : vector<1x256xf32> to vector<8x256xf32>
    %50 = arith.addf %47, %49 : vector<8x256xf32>
    %cst_25 = arith.constant 0.000000e+00 : f32
    %51 = vector.broadcast %cst_25 : f32 to vector<8x256xf32>
    %52 = arith.maximumf %50, %51 : vector<8x256xf32>
    %53 = arith.truncf %52 : vector<8x256xf32> to vector<8x256xbf16>
    %c0_26 = arith.constant 0 : index
    %c0_27 = arith.constant 0 : index
    %54 = vector.load %arg7[%c0_26, %c0_27] : memref<256x768xbf16, #tpu.memory_space<vmem>>, vector<256x768xbf16>
    %cst_28 = arith.constant dense<0.000000e+00> : vector<8x768xf32>
    %55 = tpu.matmul %53, %54, %cst_28 {dimension_numbers = #tpu.dot_dimension_numbers<[1], [0], [0], [1], [0, 0, 1, 1], [], []>} : vector<8x256xbf16>, vector<256x768xbf16>, vector<8x768xf32> -> vector<8x768xf32>
    %c0_29 = arith.constant 0 : index
    %c0_30 = arith.constant 0 : index
    %56 = vector.load %arg8[%c0_29, %c0_30] : memref<1x768xf32, #tpu.memory_space<vmem>>, vector<1x768xf32>
    %57 = vector.broadcast %56 : vector<1x768xf32> to vector<8x768xf32>
    %58 = arith.addf %55, %57 : vector<8x768xf32>
    %59 = vector.extract_strided_slice %58 {offsets = [0, 0], sizes = [8, 256], strides = [1, 1]} : vector<8x768xf32> to vector<8x256xf32>
    %60 = arith.negf %59 : vector<8x256xf32>
    %61 = math.exp %60 : vector<8x256xf32>
    %cst_31 = arith.constant 1.000000e+00 : f32
    %62 = vector.broadcast %cst_31 : f32 to vector<8x256xf32>
    %63 = arith.addf %62, %61 : vector<8x256xf32>
    %64 = arith.divf %62, %63 : vector<8x256xf32>
    %65 = vector.extract_strided_slice %58 {offsets = [0, 256], sizes = [8, 256], strides = [1, 1]} : vector<8x768xf32> to vector<8x256xf32>
    %66 = math.tanh %65 : vector<8x256xf32>
    %67 = vector.extract_strided_slice %58 {offsets = [0, 512], sizes = [8, 256], strides = [1, 1]} : vector<8x768xf32> to vector<8x256xf32>
    %68 = arith.negf %67 : vector<8x256xf32>
    %69 = math.exp %68 : vector<8x256xf32>
    %cst_32 = arith.constant 1.000000e+00 : f32
    %70 = vector.broadcast %cst_32 : f32 to vector<8x256xf32>
    %71 = arith.addf %70, %69 : vector<8x256xf32>
    %72 = arith.divf %70, %71 : vector<8x256xf32>
    %73 = arith.mulf %64, %66 : vector<8x256xf32>
    %74 = math.tanh %73 : vector<8x256xf32>
    %75 = arith.mulf %72, %74 : vector<8x256xf32>
    %c0_33 = arith.constant 0 : index
    %c0_34 = arith.constant 0 : index
    %76 = vector.load %arg9[%c0_33, %c0_34] : memref<8x256xf32, #tpu.memory_space<vmem>>, vector<8x256xf32>
    tpu.vector_store %arg9[%c0_33, %c0_34], %75 {strides = array<i32>} : memref<8x256xf32, #tpu.memory_space<vmem>>, vector<8x256xf32>,
    return
  }
}

</mosaic_0001>

<bundles_post_ra>
// kernel: tpu_custom_call.1
= control target key start
LH: loop header
LB: loop body
LE: loop exit
PB: predicated region body
PF: predicated region fallthrough
CT: control target
= control target key end

     0   :  { %14 = vsyncpa [#allocation3], 0  ;;  %s1938_s0 = inlined_call_operand.hbm [shape: f32[8,128], index: 0, kind: input, shape index: {}]   ;;  %s1939_s1 = inlined_call_operand.hbm [shape: bf16[128,128], index: 1, kind: input, shape index: {}]   ;;  %s1940_s2 = inlined_call_operand.vmem [shape: f32[1,128], index: 2, kind: input, shape index: {}]   ;;  %s1941_s3 = inlined_call_operand.hbm [shape: f32[1,128], index: 3, kind: input, shape index: {}]   ;;  %s1942_s4 = inlined_call_operand.hbm [shape: bf16[128,256], index: 4, kind: input, shape index: {}]   ;;  %s1943_s5 = inlined_call_operand.vmem [shape: f32[1,256], index: 5, kind: input, shape index: {}]   ;;  %s1944_s6 = inlined_call_operand.vmem [shape: f32[1,256], index: 6, kind: input, shape index: {}]   ;;  %s1945_s7 = inlined_call_operand.hbm [shape: bf16[256,768], index: 7, kind: input, shape index: {}]   ;;  %s1946_s8 = inlined_call_operand.vmem [shape: f32[1,768], index: 8, kind: input, shape index: {}]   ;;  %s1947_s9 = inlined_call_operand.hbm [shape: f32[8,256], index: 9, kind: output, shape index: {}]  }
   0x1   :  { %15 = vsyncpa [#allocation6], 0 }
   0x2   :  { %16 = vsyncpa [#allocation9], 0 }
   0x3   :  { %17 = vsyncpa [#allocation4], 0  ;;  %s1763_s30 = smov [#allocation5]   ;;  %s1623_s13 = scalar_lea.hbm %s1939_s1, 1024 }
   0x4   :  { %s33_s10 = sshll.u32 %s1763_s30, 4  ;;  %p1624_p0 = scmp.ne.s32.totalorder %s1939_s1, %s1623_s13  ;;  %s34_s10 = int_to_ptr.vmem [resolvable:$true] %s33_s10 }
   0x5   :  { %p1627_p1 = scmp.lt.u32.totalorder %s1623_s13, %s1939_s1 }
   0x7   :  { %p1629_p2 = pnand %p1627_p1, %p1624_p0 }
   0x9   :  { %1632 = shalt.err (!%p1629_p2)
}
   0xa   :  { %s1633_s18 = scalar_lea.vmem %s34_s10, 1024  ;;  %p1638_p4 = scmp.lt.s32.totalorder %s34_s10, %s34_s10 }
   0xb   :  { %p1634_p3 = scmp.ne.s32.totalorder %s34_s10, %s1633_s18  ;;  %p1639_p5 = scmp.lt.s32.totalorder %s1633_s18, %s1633_s18 }
   0xd   :  { %p1640_p6 = por %p1639_p5, %p1638_p4 }
   0xf   :  { %p1641_p7 = pnand %p1640_p6, %p1634_p3 }
  0x11   :  { %1644 = shalt.err (!%p1641_p7)
}
  0x12   :  { %s1764_s19 = smov 64   ;;  %s1765_s20 = smov 4  }
  0x13   :  { %39 = dma.hbm_to_vmem [thread:$0]  %s1939_s1, 1024, %s34_s10, [#allocation6], %s1764_s19, %s1764_s19, %s1765_s20  }
  0x14   :  { %s1766_s23 = smov [#allocation8]   ;;  %s1645_s27 = scalar_lea.hbm %s1942_s4, 2048 }
  0x15   :  { %s57_s24 = sshll.u32 %s1766_s23, 4  ;;  %p1646_p8 = scmp.ne.s32.totalorder %s1942_s4, %s1645_s27  ;;  %s58_s24 = int_to_ptr.vmem [resolvable:$true] %s57_s24 }
  0x16   :  { %p1649_p9 = scmp.lt.u32.totalorder %s1645_s27, %s1942_s4 }
  0x18   :  { %p1651_p10 = pnand %p1649_p9, %p1646_p8 }
  0x1a   :  { %1654 = shalt.err (!%p1651_p10)
}
  0x1b   :  { %s1655_s12 = scalar_lea.vmem %s58_s24, 2048  ;;  %p1660_p12 = scmp.lt.s32.totalorder %s58_s24, %s58_s24 }
  0x1c   :  { %p1656_p11 = scmp.ne.s32.totalorder %s58_s24, %s1655_s12  ;;  %p1661_p13 = scmp.lt.s32.totalorder %s1655_s12, %s1655_s12 }
  0x1e   :  { %p1662_p0 = por %p1661_p13, %p1660_p12 }
  0x20   :  { %p1663_p1 = pnand %p1662_p0, %p1656_p11 }
  0x22   :  { %1666 = shalt.err (!%p1663_p1)
}
  0x23   :  { %s1767_s1 = smov 128   ;;  %s1768_s10 = smov 8  }
  0x24   :  { %63 = dma.hbm_to_vmem [thread:$0]  %s1942_s4, 2048, %s58_s24, [#allocation9], %s1767_s1, %s1767_s1, %s1768_s10  }
  0x25   :  { %s1769_s15 = smov [#allocation2]   ;;  %s1770_s17 = smov [#allocation7]  }
  0x26   :  { %s24_s16 = sshll.u32 %s1769_s15, 4  ;;  %s48_s18 = sshll.u32 %s1770_s17, 4  ;;  %s25_s16 = int_to_ptr.vmem [resolvable:$true] %s24_s16  ;;  %s49_s18 = int_to_ptr.vmem [resolvable:$true] %s48_s18 }
  0x27   :  { %s1667_s21 = scalar_lea.hbm %s1938_s0, 128 }
  0x28   :  { %p1668_p2 = scmp.ne.s32.totalorder %s1938_s0, %s1667_s21  ;;  %p1671_p3 = scmp.lt.u32.totalorder %s1667_s21, %s1938_s0 }
  0x2a   :  { %p1673_p4 = pnand %p1671_p3, %p1668_p2 }
  0x2c   :  { %1676 = shalt.err (!%p1673_p4)
}
  0x2d   :  { %s1677_s4 = scalar_lea.vmem %s25_s16, 128  ;;  %p1682_p6 = scmp.lt.s32.totalorder %s25_s16, %s25_s16 }
  0x2e   :  { %p1678_p5 = scmp.ne.s32.totalorder %s25_s16, %s1677_s4  ;;  %p1683_p7 = scmp.lt.s32.totalorder %s1677_s4, %s1677_s4 }
  0x30   :  { %p1684_p8 = por %p1683_p7, %p1682_p6 }
  0x32   :  { %p1685_p9 = pnand %p1684_p8, %p1678_p5 }
  0x34   :  { %1688 = shalt.err (!%p1685_p9)
}
  0x35   :  { %27 = dma.hbm_to_vmem [thread:$0]  %s1938_s0, 128, %s25_s16, [#allocation3]  }
  0x36   :  { %s1689_s30 = scalar_lea.hbm %s1941_s3, 16 }
  0x37   :  { %p1690_p10 = scmp.ne.s32.totalorder %s1941_s3, %s1689_s30  ;;  %p1693_p11 = scmp.lt.u32.totalorder %s1689_s30, %s1941_s3 }
  0x39   :  { %p1695_p12 = pnand %p1693_p11, %p1690_p10 }
  0x3b   :  { %1698 = shalt.err (!%p1695_p12)
}
  0x3c   :  { %s1699_s13 = scalar_lea.vmem %s49_s18, 16  ;;  %s1703_s14 = scalar_lea.vmem %s49_s18, 32 }
  0x3d   :  { %p1700_p13 = scmp.ne.s32.totalorder %s49_s18, %s1699_s13  ;;  %p1704_p0 = scmp.lt.s32.totalorder %s49_s18, %s49_s18 }
  0x3e   :  { %p1705_p1 = scmp.lt.s32.totalorder %s1703_s14, %s1699_s13 }
  0x40   :  { %p1706_p2 = por %p1705_p1, %p1704_p0 }
  0x42   :  { %p1707_p3 = pnand %p1706_p2, %p1700_p13 }
  0x44   :  { %1710 = shalt.err (!%p1707_p3)
}
  0x45   :  { %51 = dma.hbm_to_vmem [thread:$0]  %s1941_s3, 16, %s49_s18, [#allocation6]  }
  0x46   :  { %s1771_s16 = smov [#allocation10]   ;;  %s1711_s21 = scalar_lea.hbm %s1945_s7, 12288 }
  0x47   :  { %s73_s17 = sshll.u32 %s1771_s16, 4  ;;  %p1712_p4 = scmp.ne.s32.totalorder %s1945_s7, %s1711_s21  ;;  %s74_s17 = int_to_ptr.vmem [resolvable:$true] %s73_s17 }
  0x48   :  { %p1715_p5 = scmp.lt.u32.totalorder %s1711_s21, %s1945_s7 }
  0x4a   :  { %p1717_p6 = pnand %p1715_p5, %p1712_p4 }
  0x4c   :  { %1720 = shalt.err (!%p1717_p6)
}
  0x4d   :  { %s1721_s4 = scalar_lea.vmem %s74_s17, 12288  ;;  %p1726_p8 = scmp.lt.s32.totalorder %s74_s17, %s74_s17 }
  0x4e   :  { %p1722_p7 = scmp.ne.s32.totalorder %s74_s17, %s1721_s4  ;;  %p1727_p9 = scmp.lt.s32.totalorder %s1721_s4, %s1721_s4 }
  0x50   :  { %p1728_p10 = por %p1727_p9, %p1726_p8 }
  0x52   :  { %p1729_p11 = pnand %p1728_p10, %p1722_p7 }
  0x54   :  { %1732 = shalt.err (!%p1729_p11)
}
  0x55   :  { %s1772_s3 = smov 384   ;;  %s1773_s18 = smov 24  }
  0x56   :  { %79 = dma.hbm_to_vmem [thread:$0]  %s1945_s7, 12288, %s74_s17, [#allocation9], %s1772_s3, %s1772_s3, %s1773_s18  }
  0x57   :  { %1755 = dma.done.wait [#allocation3], 128  }
  0x58   :  { %1756 = vsyncadd [#allocation3], 4294967168 }
  0x59   :  { %1757 = dma.done.wait [#allocation6], 1040  }
  0x5a   :  { %1758 = vsyncadd [#allocation6], 4294966256 }
  0x5b   :  { %1759 = dma.done.wait [#allocation9], 14336  }
  0x5c   :  { %1760 = vsyncadd [#allocation9], 4294952960  ;;  %v1774_v0 = vmov 0.0   ;;  %vm1775_vm0 = vmmov 0   ;;  %v1417_v1 = vld [vmem:[#allocation5] sm:$0xff]   ;;  %v1418_v2 = vld [vmem:[#allocation5 + $0x8] sm:$0xff]   ;;  %v225_v49 = vlaneseq }
  0x5d   :  { %1381 = vmatprep.subr.bf16.mxu1 %v1774_v0  ;;  %1397 = vmatprep.mubr.msk.bf16.mxu1 %vm1775_vm0, %v1774_v0  ;;  %v1419_v3 = vld [vmem:[#allocation5 + $0x10] sm:$0xff]   ;;  %v1420_v4 = vld [vmem:[#allocation5 + $0x18] sm:$0xff]   ;;  %v1421_v5 = vld [vmem:[#allocation5 + $0x20] sm:$0xff]   ;;  %v1776_v27 = vmov 0  }
  0x5e   :  { %1382 = vmatpush3.bf16.msra.mxu1 %v1417_v1  ;;  %v1422_v6 = vld [vmem:[#allocation5 + $0x28] sm:$0xff]   ;;  %v1423_v7 = vld [vmem:[#allocation5 + $0x30] sm:$0xff]   ;;  %v1424_v8 = vld [vmem:[#allocation5 + $0x38] sm:$0xff]   ;;  %v1889_v50 = vshrl.u32 %v225_v49, 7 }
  0x5f   :  { %1383 = vmatprep.subr.bf16.mxu1 %v1774_v0  ;;  %v98_v9 = vld [vmem:[#allocation2] sm:$0xff]  ;;  %v1427_v11 = vld [vmem:[#allocation8 + $0x4] ss:$8 sps:$4 sm:$0xff]   ;;  %v1425_v12 = vld [vmem:[#allocation8] ss:$8 sps:$4 sm:$0xff]  }
  0x60   :  { %v99_v10 = vpack.c.bf16 %v98_v9, %v98_v9  ;;  %v1430_v13 = vld [vmem:[#allocation8 + $0x14] ss:$8 sps:$4 sm:$0xff]   ;;  %v1428_v14 = vld [vmem:[#allocation8 + $0x10] ss:$8 sps:$4 sm:$0xff]   ;;  %v1433_v15 = vld [vmem:[#allocation8 + $0x24] ss:$8 sps:$4 sm:$0xff]  }
  0x61   :  { %v1431_v16 = vld [vmem:[#allocation8 + $0x20] ss:$8 sps:$4 sm:$0xff]   ;;  %v1436_v17 = vld [vmem:[#allocation8 + $0x34] ss:$8 sps:$4 sm:$0xff]   ;;  %v1434_v18 = vld [vmem:[#allocation8 + $0x30] ss:$8 sps:$4 sm:$0xff]  }
  0x62   :  { %1384 = vmatpush3.bf16.msra.mxu1 %v1418_v2  ;;  %v1439_v19 = vld [vmem:[#allocation8 + $0x44] ss:$8 sps:$4 sm:$0xff]   ;;  %v1437_v20 = vld [vmem:[#allocation8 + $0x40] ss:$8 sps:$4 sm:$0xff]   ;;  %v1442_v21 = vld [vmem:[#allocation8 + $0x54] ss:$8 sps:$4 sm:$0xff]  }
  0x63   :  { %1385 = vmatprep.subr.bf16.mxu1 %v1774_v0  ;;  %v1440_v22 = vld [vmem:[#allocation8 + $0x50] ss:$8 sps:$4 sm:$0xff]   ;;  %v1445_v23 = vld [vmem:[#allocation8 + $0x64] ss:$8 sps:$4 sm:$0xff]   ;;  %v1443_v24 = vld [vmem:[#allocation8 + $0x60] ss:$8 sps:$4 sm:$0xff]  }
  0x64   :  { %v1446_v25 = vld [vmem:[#allocation8 + $0x70] ss:$8 sps:$4 sm:$0xff]   ;;  %v1448_v26 = vld [vmem:[#allocation8 + $0x74] ss:$8 sps:$4 sm:$0xff]   ;;  %v1895_v52 = vsub.s32 0, %v1889_v50 }
  0x65   :  { %v220_v51 = vld [vmem:[%s1940_s2] sm:$0x1]  ;;  %v1255_v56 = vld [vmem:[#allocation7] ss:$0 sm:$0xff]  ;;  %v1451_v62 = vld [vmem:[#allocation10] ss:$24 sps:$4 sm:$0xff]  }
  0x66   :  { %1386 = vmatpush3.bf16.msra.mxu1 %v1419_v3  ;;  %v1449_v61 = vld [vmem:[#allocation10 + $0x4] ss:$24 sps:$4 sm:$0xff]   ;;  %v1455_v1 = vld [vmem:[#allocation10 + $0x34] ss:$24 sps:$4 sm:$0xff]   ;;  %v1457_v2 = vld [vmem:[#allocation10 + $0x30] ss:$24 sps:$4 sm:$0xff]  }
  0x67   :  { %1387 = vmatprep.subr.bf16.mxu1 %v1774_v0  ;;  %v1454_v63 = vld [vmem:[#allocation10 + $0xc] ss:$24 sps:$4 sm:$0xff]   ;;  %1073 = vmatprep.subr.bf16.mxu0 %v1449_v61  ;;  %v1460_v3 = vld [vmem:[#allocation10 + $0x3c] ss:$24 sps:$4 sm:$0xff]  }
  0x68   :  { %1074 = vmatpush1.bf16.msra.mxu0 %v1451_v62  ;;  %v1467_v9 = vld [vmem:[#allocation10 + $0x94] ss:$24 sps:$4 sm:$0xff]   ;;  %v1542_v62 = vld [vmem:[#allocation10 + $0x2d8] ss:$24 sps:$4 sm:$0xff]  }
  0x69   :  { %1075 = vmatprep.subr.bf16.mxu0 %v1455_v1  ;;  %v1527_v49 = vld [vmem:[#allocation10 + $0x274] ss:$24 sps:$4 sm:$0xff]  }
  0x6a   :  { %1388 = vmatpush3.bf16.msra.mxu1 %v1420_v4  ;;  %v1458_v4 = vld [vmem:[#allocation10 + $0x38] ss:$24 sps:$4 sm:$0xff]   ;;  %v1544_v61 = vld [vmem:[#allocation10 + $0x2dc] ss:$24 sps:$4 sm:$0xff]  }
  0x6b   :  { %1389 = vmatprep.subr.bf16.mxu1 %v1774_v0 }
  0x6c   :  { %1076 = vmatpush1.bf16.msra.mxu0 %v1457_v2 }
  0x6e   :  { %1390 = vmatpush3.bf16.msra.mxu1 %v1421_v5  ;;  %v1461_v5 = vld [vmem:[#allocation10 + $0x64] ss:$24 sps:$4 sm:$0xff]  }
  0x6f   :  { %1391 = vmatprep.subr.bf16.mxu1 %v1774_v0  ;;  %1077 = vmatprep.subr.bf16.mxu0 %v1461_v5 }
  0x72   :  { %1392 = vmatpush3.bf16.msra.mxu1 %v1422_v6  ;;  %v1463_v6 = vld [vmem:[#allocation10 + $0x60] ss:$24 sps:$4 sm:$0xff]  }
  0x73   :  { %1393 = vmatprep.subr.bf16.mxu1 %v1774_v0  ;;  %1078 = vmatpush1.bf16.msra.mxu0 %v1463_v6 }
  0x74   :  { %1079 = vmatprep.subr.bf16.mxu0 %v1467_v9 }
  0x76   :  { %1394 = vmatpush3.bf16.msra.mxu1 %v1423_v7  ;;  %v1466_v7 = vld [vmem:[#allocation10 + $0x6c] ss:$24 sps:$4 sm:$0xff]  }
  0x77   :  { %1395 = vmatprep.subr.bf16.mxu1 %v1774_v0  ;;  %v1452_v0 = vld [vmem:[#allocation10 + $0x8] ss:$24 sps:$4 sm:$0xff]  }
  0x7a   :  { %1396 = vmatpush3.bf16.msra.mxu1 %v1424_v8  ;;  %v1464_v8 = vld [vmem:[#allocation10 + $0x68] ss:$24 sps:$4 sm:$0xff]  }
  0x7b   :  { %337 = vmatprep.subr.bf16.mxu1 %v1427_v11  ;;  %v1472_v11 = vld [vmem:[#allocation10 + $0x9c] ss:$24 sps:$4 sm:$0xff]  }
  0x7d   :  { %1398 = vmatmul.mubr.bf16.vlgmr.msra.gmra.mrb[0].mxu1 %v99_v10  ;;  %v1469_v10 = vld [vmem:[#allocation10 + $0x90] ss:$24 sps:$4 sm:$0xff]  }
  0x7e   :  { %338 = vmatpush1.bf16.msra.mxu1 %v1425_v12  ;;  %369 = vmatprep.mubr.bf16.mxu1 %v1776_v27  ;;  %v1470_v12 = vld [vmem:[#allocation10 + $0x98] ss:$24 sps:$4 sm:$0xff]   ;;  %v1496_v27 = vld [vmem:[#allocation10 + $0x15c] ss:$24 sps:$4 sm:$0xff]  }
  0x7f   :  { %339 = vmatprep.subr.bf16.mxu1 %v1430_v13  ;;  %1080 = vmatpush1.bf16.msra.mxu0 %v1469_v10  ;;  %v1473_v13 = vld [vmem:[#allocation10 + $0xc4] ss:$24 sps:$4 sm:$0xff]  }
  0x80   :  { %1081 = vmatprep.subr.bf16.mxu0 %v1473_v13 }
  0x82   :  { %340 = vmatpush1.bf16.msra.mxu1 %v1428_v14  ;;  %v1475_v14 = vld [vmem:[#allocation10 + $0xc0] ss:$24 sps:$4 sm:$0xff]  }
  0x83   :  { %341 = vmatprep.subr.bf16.mxu1 %v1433_v15  ;;  %v1478_v15 = vld [vmem:[#allocation10 + $0xcc] ss:$24 sps:$4 sm:$0xff]   ;;  %1082 = vmatpush1.bf16.msra.mxu0 %v1475_v14 }
  0x86   :  { %342 = vmatpush1.bf16.msra.mxu1 %v1431_v16  ;;  %v1476_v16 = vld [vmem:[#allocation10 + $0xc8] ss:$24 sps:$4 sm:$0xff]  }
  0x87   :  { %343 = vmatprep.subr.bf16.mxu1 %v1436_v17  ;;  %v1479_v17 = vld [vmem:[#allocation10 + $0xf4] ss:$24 sps:$4 sm:$0xff]  }
  0x88   :  { %1083 = vmatprep.subr.bf16.mxu0 %v1479_v17 }
  0x8a   :  { %344 = vmatpush1.bf16.msra.mxu1 %v1434_v18  ;;  %v1481_v18 = vld [vmem:[#allocation10 + $0xf0] ss:$24 sps:$4 sm:$0xff]  }
  0x8b   :  { %345 = vmatprep.subr.bf16.mxu1 %v1439_v19  ;;  %v1484_v19 = vld [vmem:[#allocation10 + $0xfc] ss:$24 sps:$4 sm:$0xff]   ;;  %1084 = vmatpush1.bf16.msra.mxu0 %v1481_v18 }
  0x8e   :  { %346 = vmatpush1.bf16.msra.mxu1 %v1437_v20  ;;  %v1482_v20 = vld [vmem:[#allocation10 + $0xf8] ss:$24 sps:$4 sm:$0xff]  }
  0x8f   :  { %347 = vmatprep.subr.bf16.mxu1 %v1442_v21  ;;  %v1485_v21 = vld [vmem:[#allocation10 + $0x124] ss:$24 sps:$4 sm:$0xff]  }
  0x90   :  { %1085 = vmatprep.subr.bf16.mxu0 %v1485_v21 }
  0x92   :  { %348 = vmatpush1.bf16.msra.mxu1 %v1440_v22  ;;  %v1487_v22 = vld [vmem:[#allocation10 + $0x120] ss:$24 sps:$4 sm:$0xff]  }
  0x93   :  { %349 = vmatprep.subr.bf16.mxu1 %v1445_v23  ;;  %v1490_v23 = vld [vmem:[#allocation10 + $0x12c] ss:$24 sps:$4 sm:$0xff]   ;;  %1086 = vmatpush1.bf16.msra.mxu0 %v1487_v22 }
  0x96   :  { %350 = vmatpush1.bf16.msra.mxu1 %v1443_v24  ;;  %v1488_v24 = vld [vmem:[#allocation10 + $0x128] ss:$24 sps:$4 sm:$0xff]  }
  0x97   :  { %351 = vmatprep.subr.bf16.mxu1 %v1448_v26  ;;  %v1493_v26 = vld [vmem:[#allocation10 + $0x150] ss:$24 sps:$4 sm:$0xff]  }
  0x9a   :  { %352 = vmatpush1.bf16.msra.mxu1 %v1446_v25  ;;  %v1491_v25 = vld [vmem:[#allocation10 + $0x154] ss:$24 sps:$4 sm:$0xff]  }
  0x9b   :  { %1114 = vmatprep.subr.bf16.mxu1 %v1454_v63  ;;  %1087 = vmatprep.subr.bf16.mxu0 %v1491_v25  ;;  %v1547_v63 = vld [vmem:[#allocation10 + $0x14] ss:$24 sps:$4 sm:$0xff]  }
  0x9c   :  { %1088 = vmatpush1.bf16.msra.mxu0 %v1493_v26 }
 0x150   :  { %v198_v28 = vpop.f32.mrb[0].mxu1 }
 0x151   :  { %v204_v29 = vrot.slane %v198_v28, 4  ;;  %v1399_v30 = vpop.f32.mrb[1].mxu1 }
 0x152   :  { %v201_v31 = vpop.f32.mrb[2].mxu1  ;;  %v1499_v30 = vld [vmem:[#allocation10 + $0x180] ss:$24 sps:$4 sm:$0xff]  }
 0x153   :  { %v205_v32 = vadd.f32 %v204_v29, %v198_v28  ;;  %v1400_v33 = vpop.f32.mrb[3].mxu1  ;;  %v1497_v29 = vld [vmem:[#allocation10 + $0x184] ss:$24 sps:$4 sm:$0xff]  }
 0x154   :  { %v1502_v31 = vld [vmem:[#allocation10 + $0x18c] ss:$24 sps:$4 sm:$0xff]   ;;  %1089 = vmatprep.subr.bf16.mxu0 %v1497_v29 }
 0x155   :  { %v206_v34 = vrot.slane %v205_v32, 2  ;;  %1090 = vmatpush1.bf16.msra.mxu0 %v1499_v30  ;;  %v1503_v33 = vld [vmem:[#allocation10 + $0x1b4] ss:$24 sps:$4 sm:$0xff]  }
 0x156   :  { %1091 = vmatprep.subr.bf16.mxu0 %v1503_v33 }
 0x157   :  { %v207_v35 = vadd.f32 %v206_v34, %v205_v32  ;;  %v1500_v32 = vld [vmem:[#allocation10 + $0x188] ss:$24 sps:$4 sm:$0xff]  }
 0x158   :  { %v1505_v34 = vld [vmem:[#allocation10 + $0x1b0] ss:$24 sps:$4 sm:$0xff]  }
 0x159   :  { %v208_v36 = vrot.slane %v207_v35, 1  ;;  %1092 = vmatpush1.bf16.msra.mxu0 %v1505_v34 }
 0x15b   :  { %v209_v37 = vadd.f32 %v208_v36, %v207_v35  ;;  %v1508_v35 = vld [vmem:[#allocation10 + $0x1bc] ss:$24 sps:$4 sm:$0xff]   ;;  %v1506_v36 = vld [vmem:[#allocation10 + $0x1b8] ss:$24 sps:$4 sm:$0xff]  }
 0x15d   :  { %v210_v38 = vmul.f32 0.125, %v209_v37  ;;  %v1509_v37 = vld [vmem:[#allocation10 + $0x1e4] ss:$24 sps:$4 sm:$0xff]  }
 0x15e   :  { %1093 = vmatprep.subr.bf16.mxu0 %v1509_v37 }
 0x15f   :  { %v211_v39 = vsub.f32 %v198_v28, %v210_v38  ;;  %v1494_v28 = vld [vmem:[#allocation10 + $0x158] ss:$24 sps:$4 sm:$0xff]  }
 0x160   :  { %v1511_v38 = vld [vmem:[#allocation10 + $0x1e0] ss:$24 sps:$4 sm:$0xff]  }
 0x161   :  { %v212_v40 = vmul.f32 %v211_v39, %v211_v39  ;;  %1094 = vmatpush1.bf16.msra.mxu0 %v1511_v38  ;;  %v1777_v38 = vmov 1966171168  }
 0x163   :  { %v213_v41 = vrot.slane %v212_v40, 4 }
 0x165   :  { %v214_v42 = vadd.f32 %v213_v41, %v212_v40  ;;  %v1512_v40 = vld [vmem:[#allocation10 + $0x1e8] ss:$24 sps:$4 sm:$0xff]   ;;  %v1515_v41 = vld [vmem:[#allocation10 + $0x214] ss:$24 sps:$4 sm:$0xff]  }
 0x166   :  { %1095 = vmatprep.subr.bf16.mxu0 %v1515_v41 }
 0x167   :  { %v215_v43 = vrot.slane %v214_v42, 2 }
 0x169   :  { %v216_v44 = vadd.f32 %v215_v43, %v214_v42  ;;  %v1517_v42 = vld [vmem:[#allocation10 + $0x210] ss:$24 sps:$4 sm:$0xff]   ;;  %v1520_v43 = vld [vmem:[#allocation10 + $0x21c] ss:$24 sps:$4 sm:$0xff]  }
 0x16a   :  { %1096 = vmatpush1.bf16.msra.mxu0 %v1517_v42 }
 0x16b   :  { %v217_v45 = vrot.slane %v216_v44, 1 }
 0x16d   :  { %v218_v46 = vadd.f32 %v217_v45, %v216_v44  ;;  %v1518_v44 = vld [vmem:[#allocation10 + $0x218] ss:$24 sps:$4 sm:$0xff]   ;;  %v1521_v45 = vld [vmem:[#allocation10 + $0x244] ss:$24 sps:$4 sm:$0xff]  }
 0x16e   :  { %1097 = vmatprep.subr.bf16.mxu0 %v1521_v45 }
 0x16f   :  { %v219_v47 = vmul.f32 0.125, %v218_v46  ;;  %v1523_v46 = vld [vmem:[#allocation10 + $0x240] ss:$24 sps:$4 sm:$0xff]  }
 0x170   :  { %1098 = vmatpush1.bf16.msra.mxu0 %v1523_v46  ;;  %v410_v46 = vld [vmem:[%s1943_s5] sm:$0x3] }
 0x171   :  { %v221_v48 = vadd.f32 1e-05, %v219_v47  ;;  %v1526_v47 = vld [vmem:[#allocation10 + $0x24c] ss:$24 sps:$4 sm:$0xff]   ;;  %1099 = vmatprep.subr.bf16.mxu0 %v1527_v49  ;;  %v447_v49 = vld [vmem:[%s1944_s6] sm:$0x3] }
 0x173   :  { %1593 = vrsqrt.f32 %v221_v48  ;;  %v1524_v48 = vld [vmem:[#allocation10 + $0x248] ss:$24 sps:$4 sm:$0xff]  }
 0x17d   :  { %v1594_v53 = vpop.eup %1593 }
 0x17e   :  { %v223_v54 = vmul.f32 %v1594_v53, %v220_v51  ;;  %v1529_v51 = vld [vmem:[#allocation10 + $0x270] ss:$24 sps:$4 sm:$0xff]   ;;  %v1532_v53 = vld [vmem:[#allocation10 + $0x27c] ss:$24 sps:$4 sm:$0xff]  }
 0x17f   :  { %1100 = vmatpush1.bf16.msra.mxu0 %v1529_v51 }
 0x180   :  { %v228_v55 = vrot.slane %v223_v54, %v1895_v52  ;;  %v1530_v54 = vld [vmem:[#allocation10 + $0x278] ss:$24 sps:$4 sm:$0xff]  }
 0x182   :  { %v230_v57 = vmul.f32 %v228_v55, %v211_v39  ;;  %v1514_v39 = vld [vmem:[#allocation10 + $0x1ec] ss:$24 sps:$4 sm:$0xff]  }
 0x183   :  { %v1533_v55 = vld [vmem:[#allocation10 + $0x2a4] ss:$24 sps:$4 sm:$0xff]  }
 0x184   :  { %v238_v58 = vadd.f32 %v1255_v56, %v230_v57  ;;  %v1535_v56 = vld [vmem:[#allocation10 + $0x2a0] ss:$24 sps:$4 sm:$0xff]   ;;  %v1538_v57 = vld [vmem:[#allocation10 + $0x2ac] ss:$24 sps:$4 sm:$0xff]   ;;  %1101 = vmatprep.subr.bf16.mxu0 %v1533_v55 }
 0x185   :  { %1102 = vmatpush1.bf16.msra.mxu0 %v1535_v56  ;;  %v452_v56 = vrot.slane %v447_v49, %v1895_v52 }
 0x186   :  { %v239_v59 = vmax.f32 %v238_v58, 0.0  ;;  %v1536_v58 = vld [vmem:[#allocation10 + $0x2a8] ss:$24 sps:$4 sm:$0xff]  }
 0x188   :  { %v240_v60 = vpack.c.bf16 %v239_v59, %v239_v59  ;;  %v1539_v59 = vld [vmem:[#allocation10 + $0x2d4] ss:$24 sps:$4 sm:$0xff]  }
 0x189   :  { %1103 = vmatprep.subr.bf16.mxu0 %v1539_v59 }
 0x18a   :  { %370 = vmatmul.mubr.bf16.vlgmr.msra.gmra.mrb[4].mxu1 %v240_v60  ;;  %v1541_v60 = vld [vmem:[#allocation10 + $0x2d0] ss:$24 sps:$4 sm:$0xff]  }
 0x18b   :  { %1115 = vmatpush1.bf16.msra.mxu1 %v1452_v0  ;;  %1104 = vmatpush1.bf16.msra.mxu0 %v1541_v60 }
 0x18c   :  { %1116 = vmatprep.subr.bf16.mxu1 %v1460_v3  ;;  %1155 = vmatprep.subr.bf16.mxu0 %v1547_v63 }
 0x18f   :  { %1117 = vmatpush1.bf16.msra.mxu1 %v1458_v4 }
 0x190   :  { %1118 = vmatprep.subr.bf16.mxu1 %v1466_v7 }
 0x193   :  { %1119 = vmatpush1.bf16.msra.mxu1 %v1464_v8 }
 0x194   :  { %1120 = vmatprep.subr.bf16.mxu1 %v1472_v11 }
 0x197   :  { %1121 = vmatpush1.bf16.msra.mxu1 %v1470_v12 }
 0x198   :  { %1122 = vmatprep.subr.bf16.mxu1 %v1478_v15 }
 0x19b   :  { %1123 = vmatpush1.bf16.msra.mxu1 %v1476_v16 }
 0x19c   :  { %1124 = vmatprep.subr.bf16.mxu1 %v1484_v19 }
 0x19f   :  { %1125 = vmatpush1.bf16.msra.mxu1 %v1482_v20 }
 0x1a0   :  { %1126 = vmatprep.subr.bf16.mxu1 %v1490_v23 }
 0x1a3   :  { %1127 = vmatpush1.bf16.msra.mxu1 %v1488_v24 }
 0x1a4   :  { %1128 = vmatprep.subr.bf16.mxu1 %v1496_v27 }
 0x1a7   :  { %1129 = vmatpush1.bf16.msra.mxu1 %v1494_v28 }
 0x1a8   :  { %1130 = vmatprep.subr.bf16.mxu1 %v1502_v31 }
 0x1ab   :  { %1131 = vmatpush1.bf16.msra.mxu1 %v1500_v32 }
 0x1ac   :  { %1132 = vmatprep.subr.bf16.mxu1 %v1508_v35 }
 0x1af   :  { %1133 = vmatpush1.bf16.msra.mxu1 %v1506_v36 }
 0x1b0   :  { %1134 = vmatprep.subr.bf16.mxu1 %v1514_v39  ;;  %v419_v39 = vunpack.c.l.s4 %v1777_v38 }
 0x1b3   :  { %1135 = vmatpush1.bf16.msra.mxu1 %v1512_v40  ;;  %v420_v40 = vunpack.c.0.s8 %v419_v39 }
 0x1b4   :  { %1136 = vmatprep.subr.bf16.mxu1 %v1520_v43 }
 0x1b5   :  { %v423_v42 = vsub.s32 %v420_v40, %v1889_v50 }
 0x1b7   :  { %1137 = vmatpush1.bf16.msra.mxu1 %v1518_v44 }
 0x1b8   :  { %1138 = vmatprep.subr.bf16.mxu1 %v1526_v47 }
 0x1bb   :  { %1139 = vmatpush1.bf16.msra.mxu1 %v1524_v48  ;;  %v1903_v48 = vsub.s32 1, %v1889_v50 }
 0x1bc   :  { %1140 = vmatprep.subr.bf16.mxu1 %v1532_v53 }
 0x1bf   :  { %1141 = vmatpush1.bf16.msra.mxu1 %v1530_v54  ;;  %v456_v54 = vrot.slane %v447_v49, %v1903_v48  ;;  %v577_v49 = vsub.s32 3, %v1889_v50 }
 0x1c0   :  { %1142 = vmatprep.subr.bf16.mxu1 %v1538_v57 }
 0x1c3   :  { %1143 = vmatpush1.bf16.msra.mxu1 %v1536_v58 }
 0x1c4   :  { %1144 = vmatprep.subr.bf16.mxu1 %v1544_v61 }
 0x1c7   :  { %1145 = vmatpush1.bf16.msra.mxu1 %v1542_v62 }
 0x25d   :  { %v371_v0 = vpop.f32.mrb[4].mxu1 }
 0x25e   :  { %v378_v1 = vrot.slane %v371_v0, 4  ;;  %v373_v2 = vpop.f32.mrb[5].mxu1 }
 0x25f   :  { %v384_v3 = vrot.slane %v373_v2, 4  ;;  %v375_v4 = vpop.f32.mrb[6].mxu1 }
 0x260   :  { %v379_v5 = vadd.f32 %v378_v1, %v371_v0  ;;  %v376_v6 = vpop.f32.mrb[7].mxu1  ;;  %v1553_v4 = vld [vmem:[#allocation10 + $0x74] ss:$24 sps:$4 sm:$0xff]  }
 0x261   :  { %v385_v7 = vadd.f32 %v384_v3, %v373_v2  ;;  %v1548_v3 = vld [vmem:[#allocation10 + $0x40] ss:$24 sps:$4 sm:$0xff]   ;;  %v1556_v6 = vld [vmem:[#allocation10 + $0xa4] ss:$24 sps:$4 sm:$0xff]  }
 0x262   :  { %v380_v8 = vrot.slane %v379_v5, 2 }
 0x263   :  { %v386_v9 = vrot.slane %v385_v7, 2 }
 0x264   :  { %v381_v10 = vadd.f32 %v380_v8, %v379_v5  ;;  %v1551_v5 = vld [vmem:[#allocation10 + $0x70] ss:$24 sps:$4 sm:$0xff]   ;;  %v1559_v8 = vld [vmem:[#allocation10 + $0xd4] ss:$24 sps:$4 sm:$0xff]  }
 0x265   :  { %v387_v11 = vadd.f32 %v386_v9, %v385_v7  ;;  %v1554_v7 = vld [vmem:[#allocation10 + $0xa0] ss:$24 sps:$4 sm:$0xff]   ;;  %v1557_v9 = vld [vmem:[#allocation10 + $0xd0] ss:$24 sps:$4 sm:$0xff]  }
 0x266   :  { %v382_v12 = vrot.slane %v381_v10, 1 }
 0x267   :  { %v388_v13 = vrot.slane %v387_v11, 1 }
 0x268   :  { %v383_v14 = vadd.f32 %v382_v12, %v381_v10  ;;  %v1562_v10 = vld [vmem:[#allocation10 + $0x104] ss:$24 sps:$4 sm:$0xff]   ;;  %v1565_v12 = vld [vmem:[#allocation10 + $0x134] ss:$24 sps:$4 sm:$0xff]  }
 0x269   :  { %v389_v15 = vadd.f32 %v388_v13, %v387_v11  ;;  %v1560_v11 = vld [vmem:[#allocation10 + $0x100] ss:$24 sps:$4 sm:$0xff]   ;;  %v1563_v13 = vld [vmem:[#allocation10 + $0x130] ss:$24 sps:$4 sm:$0xff]  }
 0x26a   :  { %v390_v16 = vmul.f32 0.125, %v383_v14  ;;  %v1568_v14 = vld [vmem:[#allocation10 + $0x164] ss:$24 sps:$4 sm:$0xff]  }
 0x26b   :  { %v391_v17 = vmul.f32 0.125, %v389_v15  ;;  %v1566_v15 = vld [vmem:[#allocation10 + $0x160] ss:$24 sps:$4 sm:$0xff]  }
 0x26c   :  { %v392_v18 = vsub.f32 %v371_v0, %v390_v16  ;;  %v1545_v0 = vld [vmem:[#allocation10 + $0x10] ss:$24 sps:$4 sm:$0xff]   ;;  %v1571_v16 = vld [vmem:[#allocation10 + $0x194] ss:$24 sps:$4 sm:$0xff]  }
 0x26d   :  { %v393_v19 = vsub.f32 %v373_v2, %v391_v17  ;;  %v1550_v2 = vld [vmem:[#allocation10 + $0x44] ss:$24 sps:$4 sm:$0xff]   ;;  %v1569_v17 = vld [vmem:[#allocation10 + $0x190] ss:$24 sps:$4 sm:$0xff]  }
 0x26e   :  { %v394_v20 = vmul.f32 %v392_v18, %v392_v18 }
 0x26f   :  { %v395_v21 = vmul.f32 %v393_v19, %v393_v19 }
 0x270   :  { %v396_v22 = vrot.slane %v394_v20, 4 }
 0x271   :  { %v402_v23 = vrot.slane %v395_v21, 4 }
 0x272   :  { %v397_v24 = vadd.f32 %v396_v22, %v394_v20  ;;  %v1577_v20 = vld [vmem:[#allocation10 + $0x1f4] ss:$24 sps:$4 sm:$0xff]   ;;  %v1580_v22 = vld [vmem:[#allocation10 + $0x224] ss:$24 sps:$4 sm:$0xff]  }
 0x273   :  { %v403_v25 = vadd.f32 %v402_v23, %v395_v21  ;;  %v1575_v21 = vld [vmem:[#allocation10 + $0x1f0] ss:$24 sps:$4 sm:$0xff]   ;;  %v1578_v23 = vld [vmem:[#allocation10 + $0x220] ss:$24 sps:$4 sm:$0xff]  }
 0x274   :  { %v398_v26 = vrot.slane %v397_v24, 2 }
 0x275   :  { %v404_v27 = vrot.slane %v403_v25, 2 }
 0x276   :  { %v399_v28 = vadd.f32 %v398_v26, %v397_v24  ;;  %v1583_v24 = vld [vmem:[#allocation10 + $0x254] ss:$24 sps:$4 sm:$0xff]   ;;  %v1586_v26 = vld [vmem:[#allocation10 + $0x284] ss:$24 sps:$4 sm:$0xff]  }
 0x277   :  { %v405_v29 = vadd.f32 %v404_v27, %v403_v25  ;;  %v1581_v25 = vld [vmem:[#allocation10 + $0x250] ss:$24 sps:$4 sm:$0xff]   ;;  %v1584_v27 = vld [vmem:[#allocation10 + $0x280] ss:$24 sps:$4 sm:$0xff]  }
 0x278   :  { %v400_v30 = vrot.slane %v399_v28, 1 }
 0x279   :  { %v406_v31 = vrot.slane %v405_v29, 1 }
 0x27a   :  { %v401_v32 = vadd.f32 %v400_v30, %v399_v28  ;;  %v1589_v28 = vld [vmem:[#allocation10 + $0x2b4] ss:$24 sps:$4 sm:$0xff]   ;;  %v1592_v30 = vld [vmem:[#allocation10 + $0x2e4] ss:$24 sps:$4 sm:$0xff]  }
 0x27b   :  { %v407_v33 = vadd.f32 %v406_v31, %v405_v29  ;;  %v1587_v29 = vld [vmem:[#allocation10 + $0x2b0] ss:$24 sps:$4 sm:$0xff]   ;;  %v1590_v31 = vld [vmem:[#allocation10 + $0x2e0] ss:$24 sps:$4 sm:$0xff]  }
 0x27c   :  { %v408_v34 = vmul.f32 0.125, %v401_v32  ;;  %v561_v32 = vld [vmem:[%s1946_s8] sm:$0x3f]  ;;  %s1778_s8 = smov [#allocation11]  }
 0x27d   :  { %v409_v35 = vmul.f32 0.125, %v407_v33  ;;  %v566_v33 = vrot.slane %v561_v32, %v1895_v52  ;;  %s1236_s12 = sshll.u32 %s1778_s8, 4  ;;  %s1237_s12 = int_to_ptr.vmem [resolvable:$true] %s1236_s12 }
 0x27e   :  { %v411_v36 = vadd.f32 1e-05, %v408_v34  ;;  %v570_v34 = vrot.slane %v561_v32, %v1903_v48  ;;  %s1733_s1 = scalar_lea.vmem %s1237_s12, 256  ;;  %p1738_p13 = scmp.lt.s32.totalorder %s1237_s12, %s1237_s12 }
 0x27f   :  { %v412_v37 = vadd.f32 1e-05, %v409_v35  ;;  %p1734_p12 = scmp.ne.s32.totalorder %s1237_s12, %s1733_s1  ;;  %p1739_p0 = scmp.lt.s32.totalorder %s1733_s1, %s1733_s1 }
 0x280   :  { %1595 = vrsqrt.f32 %v411_v36 }
 0x281   :  { %1597 = vrsqrt.f32 %v412_v37  ;;  %p1740_p1 = por %p1739_p0, %p1738_p13 }
 0x283   :  { %p1741_p2 = pnand %p1740_p1, %p1734_p12 }
 0x28a   :  { %v1596_v41 = vpop.eup %1595 }
 0x28b   :  { %v1598_v43 = vpop.eup %1597 }
 0x28c   :  { %v417_v44 = vcombine.low %v1596_v41, %v1598_v43 }
 0x28e   :  { %v424_v45 = vrot.slane %v417_v44, %v423_v42 }
 0x290   :  { %v431_v47 = vrot.slane %v424_v45, %v423_v42 }
 0x292   :  { %v433_v51 = vmul.f32 %v431_v47, %v410_v46  ;;  %v573_v46 = vsub.s32 2, %v1889_v50 }
 0x294   :  { %v442_v53 = vrot.slane %v433_v51, %v1903_v48  ;;  %v438_v55 = vrot.slane %v433_v51, %v1895_v52  ;;  %v574_v52 = vrot.slane %v561_v32, %v573_v46  ;;  %v578_v48 = vrot.slane %v561_v32, %v577_v49 }
 0x296   :  { %v446_v57 = vmul.f32 %v442_v53, %v393_v19  ;;  %v445_v58 = vmul.f32 %v438_v55, %v392_v18  ;;  %v1574_v18 = vld [vmem:[#allocation10 + $0x1c4] ss:$24 sps:$4 sm:$0xff]   ;;  %v1572_v19 = vld [vmem:[#allocation10 + $0x1c0] ss:$24 sps:$4 sm:$0xff]  }
 0x298   :  { %v460_v59 = vadd.f32 %v456_v54, %v446_v57  ;;  %v459_v60 = vadd.f32 %v452_v56, %v445_v58 }
 0x29a   :  { %v462_v61 = vmax.f32 %v460_v59, 0.0  ;;  %v461_v62 = vmax.f32 %v459_v60, 0.0 }
 0x29c   :  { %v464_v63 = vpack.c.bf16 %v462_v61, %v462_v61  ;;  %v1912_v1 = vpack.c.bf16 %v461_v62, %v461_v62 }
 0x29e   :  { %1105 = vmatprep.mubr.bf16.mxu0 %v464_v63  ;;  %1146 = vmatprep.mubr.bf16.mxu1 %v464_v63 }
 0x29f   :  { %1106 = vmatmul.mubr.bf16.vlgmr.msra.gmra.mrb[0].mxu0 %v1912_v1  ;;  %1147 = vmatmul.mubr.bf16.vlgmr.msra.gmra.mrb[8].mxu1 %v1912_v1 }
 0x2a0   :  { %1156 = vmatpush1.bf16.msra.mxu0 %v1545_v0  ;;  %1187 = vmatprep.mubr.bf16.mxu0 %v464_v63  ;;  %v581_v0 = vsub.s32 4, %v1889_v50 }
 0x2a1   :  { %1157 = vmatprep.subr.bf16.mxu0 %v1550_v2 }
 0x2a2   :  { %v582_v2 = vrot.slane %v561_v32, %v581_v0 }
 0x2a4   :  { %1158 = vmatpush1.bf16.msra.mxu0 %v1548_v3 }
 0x2a5   :  { %1159 = vmatprep.subr.bf16.mxu0 %v1553_v4 }
 0x2a8   :  { %1160 = vmatpush1.bf16.msra.mxu0 %v1551_v5 }
 0x2a9   :  { %1161 = vmatprep.subr.bf16.mxu0 %v1556_v6 }
 0x2ac   :  { %1162 = vmatpush1.bf16.msra.mxu0 %v1554_v7 }
 0x2ad   :  { %1163 = vmatprep.subr.bf16.mxu0 %v1559_v8 }
 0x2b0   :  { %1164 = vmatpush1.bf16.msra.mxu0 %v1557_v9 }
 0x2b1   :  { %1165 = vmatprep.subr.bf16.mxu0 %v1562_v10 }
 0x2b4   :  { %1166 = vmatpush1.bf16.msra.mxu0 %v1560_v11 }
 0x2b5   :  { %1167 = vmatprep.subr.bf16.mxu0 %v1565_v12 }
 0x2b8   :  { %1168 = vmatpush1.bf16.msra.mxu0 %v1563_v13 }
 0x2b9   :  { %1169 = vmatprep.subr.bf16.mxu0 %v1568_v14 }
 0x2bc   :  { %1170 = vmatpush1.bf16.msra.mxu0 %v1566_v15 }
 0x2bd   :  { %1171 = vmatprep.subr.bf16.mxu0 %v1571_v16 }
 0x2c0   :  { %1172 = vmatpush1.bf16.msra.mxu0 %v1569_v17 }
 0x2c1   :  { %1173 = vmatprep.subr.bf16.mxu0 %v1574_v18 }
 0x2c4   :  { %1174 = vmatpush1.bf16.msra.mxu0 %v1572_v19 }
 0x2c5   :  { %1175 = vmatprep.subr.bf16.mxu0 %v1577_v20 }
 0x2c8   :  { %1176 = vmatpush1.bf16.msra.mxu0 %v1575_v21 }
 0x2c9   :  { %1177 = vmatprep.subr.bf16.mxu0 %v1580_v22 }
 0x2cc   :  { %1178 = vmatpush1.bf16.msra.mxu0 %v1578_v23 }
 0x2cd   :  { %1179 = vmatprep.subr.bf16.mxu0 %v1583_v24 }
 0x2d0   :  { %1180 = vmatpush1.bf16.msra.mxu0 %v1581_v25 }
 0x2d1   :  { %1181 = vmatprep.subr.bf16.mxu0 %v1586_v26 }
 0x2d4   :  { %1182 = vmatpush1.bf16.msra.mxu0 %v1584_v27 }
 0x2d5   :  { %1183 = vmatprep.subr.bf16.mxu0 %v1589_v28 }
 0x2d8   :  { %1184 = vmatpush1.bf16.msra.mxu0 %v1587_v29 }
 0x2d9   :  { %1185 = vmatprep.subr.bf16.mxu0 %v1592_v30 }
 0x2dc   :  { %1186 = vmatpush1.bf16.msra.mxu0 %v1590_v31 }
 0x2df   :  { %1188 = vmatmul.mubr.bf16.vlgmr.msra.gmra.mrb[4].mxu0 %v1912_v1  ;;  %v585_v1 = vsub.s32 5, %v1889_v50 }
 0x2e1   :  { %v586_v3 = vrot.slane %v561_v32, %v585_v1 }
 0x372   :  { %v1107_v35 = vpop.f32.mrb[0].mxu0  ;;  %v1148_v36 = vpop.f32.mrb[8].mxu1 }
 0x373   :  { %v1108_v37 = vadd.f32 %v1107_v35, %v566_v33  ;;  %v1109_v38 = vpop.f32.mrb[1].mxu0  ;;  %v1150_v39 = vpop.f32.mrb[9].mxu1  ;;  %v1149_v51 = vadd.f32 %v1148_v36, %v574_v52 }
 0x374   :  { %v1110_v40 = vadd.f32 %v1109_v38, %v570_v34  ;;  %v1111_v41 = vpop.f32.mrb[2].mxu0  ;;  %v1152_v42 = vpop.f32.mrb[10].mxu1  ;;  %v1151_v53 = vadd.f32 %v1150_v39, %v578_v48 }
 0x375   :  { %v1368_v43 = vmul.f32 -1.442695, %v1108_v37  ;;  %v1112_v44 = vpop.f32.mrb[3].mxu0  ;;  %v1153_v45 = vpop.f32.mrb[11].mxu1 }
 0x376   :  { %v1369_v47 = vmul.f32 -1.442695, %v1110_v40 }
 0x377   :  { %1599 = vpow2.f32 %v1368_v43 }
 0x378   :  { %1601 = vpow2.f32 %v1369_v47 }
 0x379   :  { %1603 = vtanh.f32 %v1149_v51 }
 0x37a   :  { %1605 = vtanh.f32 %v1151_v53 }
 0x381   :  { %v1600_v54 = vpop.eup %1599 }
 0x382   :  { %v1602_v55 = vpop.eup %1601  ;;  %v1202_v56 = vadd.f32 1.0, %v1600_v54 }
 0x383   :  { %v1203_v57 = vadd.f32 1.0, %v1602_v55  ;;  %v1604_v58 = vpop.eup %1603 }
 0x384   :  { %1607 = vrcp.f32 %v1202_v56  ;;  %v1606_v59 = vpop.eup %1605 }
 0x385   :  { %1609 = vrcp.f32 %v1203_v57 }
 0x38e   :  { %v1608_v60 = vpop.eup %1607 }
 0x38f   :  { %v1610_v61 = vpop.eup %1609  ;;  %v1222_v62 = vmul.f32 %v1608_v60, %v1604_v58 }
 0x390   :  { %v1223_v63 = vmul.f32 %v1610_v61, %v1606_v59 }
 0x3b2   :  { %v1189_v4 = vpop.f32.mrb[4].mxu0 }
 0x3b3   :  { %v1190_v5 = vadd.f32 %v1189_v4, %v582_v2  ;;  %v1191_v6 = vpop.f32.mrb[5].mxu0 }
 0x3b4   :  { %v1192_v7 = vadd.f32 %v1191_v6, %v586_v3  ;;  %v1193_v8 = vpop.f32.mrb[6].mxu0 }
 0x3b5   :  { %v1370_v9 = vmul.f32 -1.442695, %v1190_v5  ;;  %v1194_v10 = vpop.f32.mrb[7].mxu0 }
 0x3b6   :  { %v1371_v11 = vmul.f32 -1.442695, %v1192_v7 }
 0x3b7   :  { %1611 = vpow2.f32 %v1370_v9 }
 0x3b8   :  { %1613 = vpow2.f32 %v1371_v11 }
 0x3b9   :  { %1615 = vtanh.f32 %v1222_v62 }
 0x3ba   :  { %1617 = vtanh.f32 %v1223_v63 }
 0x3c1   :  { %v1612_v12 = vpop.eup %1611 }
 0x3c2   :  { %v1614_v13 = vpop.eup %1613  ;;  %v1216_v14 = vadd.f32 1.0, %v1612_v12 }
 0x3c3   :  { %v1217_v15 = vadd.f32 1.0, %v1614_v13  ;;  %v1616_v50 = vpop.eup %1615 }
 0x3c4   :  { %1619 = vrcp.f32 %v1216_v14  ;;  %v1618_v16 = vpop.eup %1617 }
 0x3c5   :  { %1621 = vrcp.f32 %v1217_v15 }
 0x3ce   :  { %v1620_v17 = vpop.eup %1619 }
 0x3cf   :  { %v1622_v18 = vpop.eup %1621  ;;  %v1226_v19 = vmul.f32 %v1620_v17, %v1616_v50 }
 0x3d0   :  { %v1227_v20 = vmul.f32 %v1622_v18, %v1618_v16 }
 0x3d1   :  { %1228 = vst [vmem:[#allocation11] sm:$0xff] %v1226_v19 }
 0x3d2   :  { %1229 = vst [vmem:[#allocation11 + $0x8] sm:$0xff] %v1227_v20 }
 0x3d3   :  { %1744 = shalt.err (!%p1741_p2)
}
 0x3d4   :  { %s1745_s14 = scalar_lea.hbm %s1947_s9, 256 }
 0x3d5   :  { %p1746_p3 = scmp.ne.s32.totalorder %s1947_s9, %s1745_s14  ;;  %p1749_p4 = scmp.lt.u32.totalorder %s1745_s14, %s1947_s9 }
 0x3d7   :  { %p1751_p5 = pnand %p1749_p4, %p1746_p3 }
 0x3d9   :  { %1754 = shalt.err (!%p1751_p5)
}
 0x3da   :  { %1239 = dma.vmem_to_hbm [thread:$0]  %s1237_s12, 256, %s1947_s9, [#allocation4]  }
 0x3db   :  { %1761 = dma.done.wait [#allocation4], 256  }
 0x3dc   :  { %1762 = vsyncadd [#allocation4], 4294967040 }
 0x3dd   :  { %1243 = vsyncpa [#allocation3], 1 }
 0x3de   :  { %1244 = vsyncpa [#allocation6], 1 }
 0x3df   :  { %1245 = vsyncpa [#allocation9], 1 }
 0x3e0   :  { %1246 = vsyncpa [#allocation4], 1 }

</bundles_post_ra>
